<compile_context>
chip_gen: v5e
topology: v5e:2x2
jax: 0.10.0
libtpu: 0.0.40
codegen_flags: <defaults>
</compile_context>

<pallas_src>
import math
from functools import partial

import jax
import jax.numpy as jnp
from jax.experimental import pallas as pl
from jax.experimental.pallas import tpu as pltpu

_VMEM_LIMIT = 48 * 1024 * 1024   # fits v7x (64 MiB physical); > default scoped on v5e/v6e


def _layernorm(x, gamma, beta, eps=1e-5):
    # x: (T, C); gamma/beta: (1, C); fp32 math
    mu = jnp.mean(x, axis=-1, keepdims=True)
    xc = x - mu
    var = jnp.mean(xc * xc, axis=-1, keepdims=True)
    return xc * jax.lax.rsqrt(var + eps) * gamma + beta


def _gelu_tanh(x):
    c = math.sqrt(2.0 / math.pi)
    return 0.5 * x * (1.0 + jnp.tanh(c * (x + 0.044715 * x * x * x)))


# ---------------------------------------------------------------------------
# Kernel A: LN1 + QKV projection, tiled over (batch, row tile).
# Outputs: q, v head-major (B, nh, T, hd) bf16; k pre-transposed (B, nh, hd, T) bf16
# (lane-dense, natural MXU RHS layout for Q K^T).  The head split / K transpose is the
# only relayout and is paid once per token tile (not per KV tile of the O(T^2) loop).
# ---------------------------------------------------------------------------
def ln_qkv_kernel(x_ref, g_ref, b_ref, w_ref, bias_ref,
                  q_ref, kT_ref, v_ref, *, n_head):
    x = x_ref[0]                                  # (tr, C) fp32
    tr, C = x.shape
    hd = C // n_head

    h = _layernorm(x, g_ref[...], b_ref[...])
    # 1/sqrt(hd) already folded into the Q columns of W / bias by the wrapper.
    qkv = jnp.dot(h.astype(jnp.bfloat16), w_ref[...],
                  preferred_element_type=jnp.float32) + bias_ref[...]   # (tr, 3C) f32

    kT = qkv[:, C:2 * C].T                        # (C, tr) f32 — one 2-D transpose/tile
    for hx in range(n_head):
        q_ref[0, hx] = qkv[:, 0 * C + hx * hd: 0 * C + (hx + 1) * hd].astype(q_ref.dtype)
        v_ref[0, hx] = qkv[:, 2 * C + hx * hd: 2 * C + (hx + 1) * hd].astype(v_ref.dtype)
        kT_ref[0, hx] = kT[hx * hd:(hx + 1) * hd, :].astype(kT_ref.dtype)


# ---------------------------------------------------------------------------
# Kernel B: flash attention (online softmax over KV tiles) + c_proj + residual.
# grid = (B, q_tiles, kv_tiles); kv axis is the reduction ("arbitrary") axis.
# Causal mask only on the diagonal tile; finalize fused into the diagonal tile.
# ---------------------------------------------------------------------------
def attn_kernel(x_ref, q_ref, kT_ref, v_ref, pw_ref, pb_ref, o_ref,
                m_scr, l_scr, acc_scr, att_scr,
                *, n_head, head_dim, tq, tk):
    i = pl.program_id(1)      # query tile index
    j = pl.program_id(2)      # kv tile index (reduction axis)

    @pl.when(j == 0)
    def _init():
        m_scr[...] = jnp.full(m_scr.shape, -jnp.inf, m_scr.dtype)
        l_scr[...] = jnp.zeros(l_scr.shape, l_scr.dtype)
        acc_scr[...] = jnp.zeros(acc_scr.shape, acc_scr.dtype)

    def _update(masked):
        q = q_ref[0]          # (nh, tq, hd) bf16
        kT = kT_ref[0]        # (nh, hd, tk) bf16  (lane-dense: minor dim = seq)
        v = v_ref[0]          # (nh, tk, hd) bf16
        s = jnp.einsum('hqd,hdk->hqk', q, kT,
                       preferred_element_type=jnp.float32)         # (nh, tq, tk) f32
        if masked:
            # Diagonal tile only (tq == tk, j == i): local-index causal mask.
            rl = jax.lax.broadcasted_iota(jnp.int32, (1, tq, tk), 1)
            cl = jax.lax.broadcasted_iota(jnp.int32, (1, tq, tk), 2)
            s = jnp.where(cl <= rl, s, -jnp.inf)
        m_prev = m_scr[...]
        m_new = jnp.maximum(m_prev, jnp.max(s, axis=-1, keepdims=True))
        alpha = jnp.exp(m_prev - m_new)
        p = jnp.exp(s - m_new)
        l_scr[...] = alpha * l_scr[...] + jnp.sum(p, axis=-1, keepdims=True)
        acc_scr[...] = alpha * acc_scr[...] + jnp.einsum(
            'hqk,hkd->hqd', p.astype(jnp.bfloat16), v,
            preferred_element_type=jnp.float32)
        m_scr[...] = m_new

    @pl.when(j < i)           # interior tiles: all-true mask -> no iota/cmp/select
    def _interior():
        _update(masked=False)

    @pl.when(j == i)          # diagonal tile: masked update, then finalize
    def _diag_finalize():
        _update(masked=True)
        inv_l = pl.reciprocal(l_scr[...], approx=True)              # (nh, tq, 1) f32
        # Merge heads through a VMEM scratch (no concatenate in the value path).
        for hx in range(n_head):
            att_scr[:, hx * head_dim:(hx + 1) * head_dim] = (
                acc_scr[hx] * inv_l[hx]).astype(att_scr.dtype)
        proj = jnp.dot(att_scr[...], pw_ref[...],
                       preferred_element_type=jnp.float32) + pb_ref[...]
        o_ref[0] = (x_ref[0] + proj).astype(o_ref.dtype)            # residual in fp32
    # j > i tiles: fully masked -> skipped; their K/V DMA is avoided because the
    # BlockSpec index is clamped to min(j, i) (unchanged => no re-fetch).
    # TODO(synk): for T/tq >= ~8, replace the rectangular grid + skip with a flattened
    # lower-triangular step list via PrefetchScalarGridSpec to drop the ~0.35us/step
    # bookkeeping of skipped steps.


# ---------------------------------------------------------------------------
# Kernel C (default): LN2 + MLP + residual with both MLP weights resident in VMEM.
# grid = (B, row_tiles); weight BlockSpecs have a constant block index => fetched once
# and reused across every (batch, row-tile) instead of re-streamed from HBM.
# ---------------------------------------------------------------------------
def ln_mlp_resident_kernel(x_ref, g_ref, b_ref, fcw_ref, fcb_ref, pw_ref, pb_ref, o_ref):
    x = x_ref[0]                                                     # (tr, C) f32
    h = _layernorm(x, g_ref[...], b_ref[...])
    t = jnp.dot(h.astype(jnp.bfloat16), fcw_ref[...],
                preferred_element_type=jnp.float32) + fcb_ref[...]   # (tr, 4C) f32
    t = _gelu_tanh(t)
    y = jnp.dot(t.astype(jnp.bfloat16), pw_ref[...],
                preferred_element_type=jnp.float32) + pb_ref[...]    # (tr, C) f32
    o_ref[0] = (x + y).astype(o_ref.dtype)


# Fallback (only when the MLP weights are too large for VMEM): hidden-dim tiled with an
# fp32 accumulator.  Note: this path re-streams weight tiles per (b, i).
def ln_mlp_tiled_kernel(x_ref, g_ref, b_ref, fcw_ref, fcb_ref, pw_ref, pb_ref, o_ref,
                        hln_scr, acc_scr):
    h = pl.program_id(2)

    @pl.when(h == 0)
    def _init():
        hln_scr[...] = _layernorm(x_ref[0], g_ref[...], b_ref[...]).astype(hln_scr.dtype)
        acc_scr[...] = jnp.zeros(acc_scr.shape, acc_scr.dtype)

    t = jnp.dot(hln_scr[...], fcw_ref[...],
                preferred_element_type=jnp.float32) + fcb_ref[...]
    t = _gelu_tanh(t)
    acc_scr[...] += jnp.dot(t.astype(jnp.bfloat16), pw_ref[...],
                            preferred_element_type=jnp.float32)

    @pl.when(h == pl.num_programs(2) - 1)
    def _finalize():
        o_ref[0] = (x_ref[0] + acc_scr[...] + pb_ref[...]).astype(o_ref.dtype)


def _pick_tile(n, pref, mult):
    """Largest divisor of n that is <= pref and a multiple of `mult`; fallback n (full)."""
    for t in range(min(pref, n), 0, -1):
        if n % t == 0 and t % mult == 0:
            return t
    return n


def block_forward(x, params, n_head, *, seq_tile=256, row_tile=512, mlp_tile=512):
    (ln1_g, ln1_b, attn_w, attn_b, proj_w, proj_b,
     ln2_g, ln2_b, fc_w, fc_b, fcproj_w, fcproj_b) = params
    B, T, C = x.shape
    assert C % n_head == 0
    hd = C // n_head
    H = 4 * C

    # Attention tile: multiple of 128 (it is the lane dim of K^T) or full T.
    tq = _pick_tile(T, seq_tile, 128)
    tk = tq                       # equal tiles => exact causal tile skip & NaN-free mask
    assert tq == tk
    # Row tile for the weight-resident GEMM kernels (A, C) — decoupled from tq.
    tr = _pick_tile(T, row_tile, 128)
    nq, nr = T // tq, T // tr

    bf = jnp.bfloat16
    # Fold 1/sqrt(hd) into the Q columns of the QKV projection (host-side, once).
    scale = 1.0 / math.sqrt(hd)
    attn_w_s = attn_w.at[:, :C].multiply(scale).astype(bf)
    attn_b_s = attn_b.at[:, :C].multiply(scale)
    proj_w_b = proj_w.astype(bf)       # bf16 weights: 2x MXU throughput, half DMA bytes
    fc_w_b = fc_w.astype(bf)
    fcproj_w_b = fcproj_w.astype(bf)

    cp2 = pltpu.CompilerParams(dimension_semantics=("parallel", "parallel"),
                               vmem_limit_bytes=_VMEM_LIMIT)
    cp3 = pltpu.CompilerParams(dimension_semantics=("parallel", "parallel", "arbitrary"),
                               vmem_limit_bytes=_VMEM_LIMIT)

    # ---- A: LN1 + QKV projection -------------------------------------------
    # TODO(synk): for very large C (>= ~2048), tile the (C, 3C) c_attn weight along the
    # 3C output dim so its double-buffered footprint fits the v7x 64 MiB VMEM.
    q, kT, v = pl.pallas_call(
        partial(ln_qkv_kernel, n_head=n_head),
        out_shape=(jax.ShapeDtypeStruct((B, n_head, T, hd), bf),
                   jax.ShapeDtypeStruct((B, n_head, hd, T), bf),
                   jax.ShapeDtypeStruct((B, n_head, T, hd), bf)),
        grid=(B, nr),
        in_specs=[
            pl.BlockSpec((1, tr, C), lambda b, i: (b, i, 0)),          # x tile
            pl.BlockSpec((1, C), lambda b, i: (0, 0)),                 # ln1 gamma
            pl.BlockSpec((1, C), lambda b, i: (0, 0)),                 # ln1 beta
            pl.BlockSpec((C, 3 * C), lambda b, i: (0, 0)),             # c_attn W (bf16)
            pl.BlockSpec((1, 3 * C), lambda b, i: (0, 0)),             # c_attn b
        ],
        out_specs=(
            pl.BlockSpec((1, n_head, tr, hd), lambda b, i: (b, 0, i, 0)),   # q
            pl.BlockSpec((1, n_head, hd, tr), lambda b, i: (b, 0, 0, i)),   # k^T (lane-dense)
            pl.BlockSpec((1, n_head, tr, hd), lambda b, i: (b, 0, i, 0)),   # v
        ),
        compiler_params=cp2,
    )(x, ln1_g, ln1_b, attn_w_s, attn_b_s)

    # ---- B: flash attention + c_proj + residual -----------------------------
    x1 = pl.pallas_call(
        partial(attn_kernel, n_head=n_head, head_dim=hd, tq=tq, tk=tk),
        out_shape=jax.ShapeDtypeStruct((B, T, C), x.dtype),
        grid=(B, nq, nq),
        in_specs=[
            pl.BlockSpec((1, tq, C), lambda b, i, j: (b, i, 0)),       # x (residual)
            pl.BlockSpec((1, n_head, tq, hd), lambda b, i, j: (b, 0, i, 0)),    # q
            # clamp kv block index to min(j, i): fully-masked tiles never DMA'd
            pl.BlockSpec((1, n_head, hd, tk),
                         lambda b, i, j: (b, 0, 0, jnp.minimum(j, i))),         # k^T
            pl.BlockSpec((1, n_head, tk, hd),
                         lambda b, i, j: (b, 0, jnp.minimum(j, i), 0)),         # v
            pl.BlockSpec((C, C), lambda b, i, j: (0, 0)),              # c_proj W (bf16)
            pl.BlockSpec((1, C), lambda b, i, j: (0, 0)),              # c_proj b
        ],
        out_specs=pl.BlockSpec((1, tq, C), lambda b, i, j: (b, i, 0)),
        scratch_shapes=[
            pltpu.VMEM((n_head, tq, 1), jnp.float32),     # m (running max)
            pltpu.VMEM((n_head, tq, 1), jnp.float32),     # l (running denom)
            pltpu.VMEM((n_head, tq, hd), jnp.float32),    # acc (running numerator)
            pltpu.VMEM((tq, C), bf),                      # merged-head attention output
        ],
        compiler_params=cp3,
    )(x, q, kT, v, proj_w_b, proj_b)

    # ---- C: LN2 + MLP + residual --------------------------------------------
    resident_bytes = 8 * C * H        # both bf16 weights, double-buffered
    if resident_bytes <= 36 * 1024 * 1024:
        # Weights stay resident in VMEM (constant block index): fetched once for the
        # whole kernel instead of once per (batch, row-tile).
        x2 = pl.pallas_call(
            ln_mlp_resident_kernel,
            out_shape=jax.ShapeDtypeStruct((B, T, C), x.dtype),
            grid=(B, nr),
            in_specs=[
                pl.BlockSpec((1, tr, C), lambda b, i: (b, i, 0)),      # x1 tile
                pl.BlockSpec((1, C), lambda b, i: (0, 0)),             # ln2 gamma
                pl.BlockSpec((1, C), lambda b, i: (0, 0)),             # ln2 beta
                pl.BlockSpec((C, H), lambda b, i: (0, 0)),             # c_fc W (resident)
                pl.BlockSpec((1, H), lambda b, i: (0, 0)),             # c_fc b
                pl.BlockSpec((H, C), lambda b, i: (0, 0)),             # mlp c_proj W (resident)
                pl.BlockSpec((1, C), lambda b, i: (0, 0)),             # mlp c_proj b
            ],
            out_specs=pl.BlockSpec((1, tr, C), lambda b, i: (b, i, 0)),
            compiler_params=cp2,
        )(x1, ln2_g, ln2_b, fc_w_b, fc_b, fcproj_w_b, fcproj_b)
    else:
        # Fallback for very large C: hidden-dim tiled with fp32 accumulator.
        th = _pick_tile(H, mlp_tile, 128)
        x2 = pl.pallas_call(
            ln_mlp_tiled_kernel,
            out_shape=jax.ShapeDtypeStruct((B, T, C), x.dtype),
            grid=(B, nr, H // th),
            in_specs=[
                pl.BlockSpec((1, tr, C), lambda b, i, h: (b, i, 0)),
                pl.BlockSpec((1, C), lambda b, i, h: (0, 0)),
                pl.BlockSpec((1, C), lambda b, i, h: (0, 0)),
                pl.BlockSpec((C, th), lambda b, i, h: (0, h)),
                pl.BlockSpec((1, th), lambda b, i, h: (0, h)),
                pl.BlockSpec((th, C), lambda b, i, h: (h, 0)),
                pl.BlockSpec((1, C), lambda b, i, h: (0, 0)),
            ],
            out_specs=pl.BlockSpec((1, tr, C), lambda b, i, h: (b, i, 0)),
            scratch_shapes=[
                pltpu.VMEM((tr, C), bf),
                pltpu.VMEM((tr, C), jnp.float32),
            ],
            compiler_params=cp3,
        )(x1, ln2_g, ln2_b, fc_w_b, fc_b, fcproj_w_b, fcproj_b)

    return x2


# ---------------------------------------------------------------------------
# Pure-JAX fp32 reference (for correctness check).
# ---------------------------------------------------------------------------
def reference_block(x, params, n_head):
    (ln1_g, ln1_b, attn_w, attn_b, proj_w, proj_b,
     ln2_g, ln2_b, fc_w, fc_b, fcproj_w, fcproj_b) = params
    B, T, C = x.shape
    hd = C // n_head

    def ln(v, g, b, eps=1e-5):
        mu = jnp.mean(v, -1, keepdims=True)
        var = jnp.mean((v - mu) ** 2, -1, keepdims=True)
        return (v - mu) / jnp.sqrt(var + eps) * g + b

    h = ln(x, ln1_g, ln1_b)
    qkv = h @ attn_w + attn_b
    q, k, v = jnp.split(qkv, 3, axis=-1)
    q = q.reshape(B, T, n_head, hd).transpose(0, 2, 1, 3)
    k = k.reshape(B, T, n_head, hd).transpose(0, 2, 1, 3)
    v = v.reshape(B, T, n_head, hd).transpose(0, 2, 1, 3)
    s = jnp.einsum('bhtd,bhsd->bhts', q, k) / math.sqrt(hd)
    mask = jnp.tril(jnp.ones((T, T), bool))
    s = jnp.where(mask, s, -jnp.inf)
    p = jax.nn.softmax(s, axis=-1)
    a = jnp.einsum('bhts,bhsd->bhtd', p, v).transpose(0, 2, 1, 3).reshape(B, T, C)
    x = x + (a @ proj_w + proj_b)

    h2 = ln(x, ln2_g, ln2_b)
    h2 = h2 @ fc_w + fc_b
    cst = math.sqrt(2.0 / math.pi)
    h2 = 0.5 * h2 * (1.0 + jnp.tanh(cst * (h2 + 0.044715 * h2 ** 3)))
    x = x + (h2 @ fcproj_w + fcproj_b)
    return x


if __name__ == "__main__":
    # Small GPT-2-like config (benchmark/tune at real shapes, e.g. T=1024, C=768, 12 heads)
    B, T, C, n_head = 2, 8, 32, 4

    key = jax.random.PRNGKey(0)
    keys = jax.random.split(key, 8)

    x = jax.random.normal(keys[0], (B, T, C), jnp.float32)

    ln1_g = jnp.ones((1, C), jnp.float32)
    ln1_b = jnp.zeros((1, C), jnp.float32)
    ln2_g = jnp.ones((1, C), jnp.float32)
    ln2_b = jnp.zeros((1, C), jnp.float32)
    attn_w = 0.02 * jax.random.normal(keys[1], (C, 3 * C), jnp.float32)
    attn_b = 0.02 * jax.random.normal(keys[2], (1, 3 * C), jnp.float32)
    proj_w = 0.02 * jax.random.normal(keys[3], (C, C), jnp.float32)
    proj_b = 0.02 * jax.random.normal(keys[4], (1, C), jnp.float32)
    fc_w = 0.02 * jax.random.normal(keys[5], (C, 4 * C), jnp.float32)
    fc_b = 0.02 * jax.random.normal(keys[6], (1, 4 * C), jnp.float32)
    fcproj_w = 0.02 * jax.random.normal(keys[7], (4 * C, C), jnp.float32)
    fcproj_b = jnp.zeros((1, C), jnp.float32)

    params = (ln1_g, ln1_b, attn_w, attn_b, proj_w, proj_b,
              ln2_g, ln2_b, fc_w, fc_b, fcproj_w, fcproj_b)

    out = block_forward(x, params, n_head)
    out = jax.block_until_ready(out)

    ref = reference_block(x, params, n_head)
    assert out.shape == (B, T, C)
    # bf16 matmuls + approx reciprocal => relaxed tolerance vs fp32 reference
    assert jnp.allclose(out, ref, rtol=2e-2, atol=2e-2), "mismatch vs. JAX reference"

    print("KERNEL_OK")
</pallas_src>

<mosaic_0001>
module attributes {stable_mosaic.version = 11 : i64} {
  func.func @ln_qkv_kernel(%arg0: i32, %arg1: i32, %arg2: memref<1x8x32xf32, #tpu.memory_space<vmem>>, %arg3: memref<1x32xf32, #tpu.memory_space<vmem>>, %arg4: memref<1x32xf32, #tpu.memory_space<vmem>>, %arg5: memref<32x96xbf16, #tpu.memory_space<vmem>>, %arg6: memref<1x96xf32, #tpu.memory_space<vmem>>, %arg7: memref<1x4x8x8xbf16, #tpu.memory_space<vmem>>, %arg8: memref<1x4x8x8xbf16, #tpu.memory_space<vmem>>, %arg9: memref<1x4x8x8xbf16, #tpu.memory_space<vmem>>) attributes {dimension_semantics = [#tpu.dimension_semantics<parallel>, #tpu.dimension_semantics<parallel>], iteration_bounds = array<i64: 2, 1>, scalar_prefetch = 0 : i64, scratch_operands = 0 : i64, tpu.core_type = #tpu.core_type<tc>, window_params = [{transform_indices = @transform_0, window_bounds = array<i64: 1, 8, 32>}, {pipeline_mode = #tpu.pipeline_mode<synchronous>, transform_indices = @transform_1, window_bounds = array<i64: 1, 32>}, {pipeline_mode = #tpu.pipeline_mode<synchronous>, transform_indices = @transform_2, window_bounds = array<i64: 1, 32>}, {pipeline_mode = #tpu.pipeline_mode<synchronous>, transform_indices = @transform_3, window_bounds = array<i64: 32, 96>}, {pipeline_mode = #tpu.pipeline_mode<synchronous>, transform_indices = @transform_4, window_bounds = array<i64: 1, 96>}, {transform_indices = @transform_5, window_bounds = array<i64: 1, 4, 8, 8>}, {transform_indices = @transform_6, window_bounds = array<i64: 1, 4, 8, 8>}, {transform_indices = @transform_7, window_bounds = array<i64: 1, 4, 8, 8>}]} {
    %c0 = arith.constant 0 : index
    %c0_0 = arith.constant 0 : index
    %c0_1 = arith.constant 0 : index
    %0 = vector.load %arg2[%c0, %c0_0, %c0_1] : memref<1x8x32xf32, #tpu.memory_space<vmem>>, vector<1x8x32xf32>
    %1 = vector.shape_cast %0 : vector<1x8x32xf32> to vector<8x32xf32>
    %c0_2 = arith.constant 0 : index
    %c0_3 = arith.constant 0 : index
    %2 = vector.load %arg3[%c0_2, %c0_3] : memref<1x32xf32, #tpu.memory_space<vmem>>, vector<1x32xf32>
    %c0_4 = arith.constant 0 : index
    %c0_5 = arith.constant 0 : index
    %3 = vector.load %arg4[%c0_4, %c0_5] : memref<1x32xf32, #tpu.memory_space<vmem>>, vector<1x32xf32>
    %cst = arith.constant dense<0.000000e+00> : vector<8xf32>
    %4 = vector.multi_reduction <add>, %1, %cst [1] : vector<8x32xf32> to vector<8xf32>
    %5 = vector.shape_cast %4 : vector<8xf32> to vector<8x1xf32>
    %cst_6 = arith.constant 3.200000e+01 : f32
    %6 = vector.broadcast %cst_6 : f32 to vector<8x1xf32>
    %7 = arith.divf %5, %6 : vector<8x1xf32>
    %8 = vector.broadcast %7 : vector<8x1xf32> to vector<8x32xf32>
    %9 = arith.subf %1, %8 : vector<8x32xf32>
    %10 = arith.mulf %9, %9 : vector<8x32xf32>
    %cst_7 = arith.constant dense<0.000000e+00> : vector<8xf32>
    %11 = vector.multi_reduction <add>, %10, %cst_7 [1] : vector<8x32xf32> to vector<8xf32>
    %12 = vector.shape_cast %11 : vector<8xf32> to vector<8x1xf32>
    %cst_8 = arith.constant 3.200000e+01 : f32
    %13 = vector.broadcast %cst_8 : f32 to vector<8x1xf32>
    %14 = arith.divf %12, %13 : vector<8x1xf32>
    %cst_9 = arith.constant 9.99999974E-6 : f32
    %15 = vector.broadcast %cst_9 : f32 to vector<8x1xf32>
    %16 = arith.addf %14, %15 : vector<8x1xf32>
    %17 = math.rsqrt %16 : vector<8x1xf32>
    %18 = vector.broadcast %17 : vector<8x1xf32> to vector<8x32xf32>
    %19 = arith.mulf %9, %18 : vector<8x32xf32>
    %20 = vector.broadcast %2 : vector<1x32xf32> to vector<8x32xf32>
    %21 = arith.mulf %19, %20 : vector<8x32xf32>
    %22 = vector.broadcast %3 : vector<1x32xf32> to vector<8x32xf32>
    %23 = arith.addf %21, %22 : vector<8x32xf32>
    %24 = arith.truncf %23 : vector<8x32xf32> to vector<8x32xbf16>
    %c0_10 = arith.constant 0 : index
    %c0_11 = arith.constant 0 : index
    %25 = vector.load %arg5[%c0_10, %c0_11] : memref<32x96xbf16, #tpu.memory_space<vmem>>, vector<32x96xbf16>
    %cst_12 = arith.constant dense<0.000000e+00> : vector<8x96xf32>
    %26 = tpu.matmul %24, %25, %cst_12 {dimension_numbers = #tpu.dot_dimension_numbers<[1], [0], [0], [1], [0, 0, 1, 1], [], []>} : vector<8x32xbf16>, vector<32x96xbf16>, vector<8x96xf32> -> vector<8x96xf32>
    %c0_13 = arith.constant 0 : index
    %c0_14 = arith.constant 0 : index
    %27 = vector.load %arg6[%c0_13, %c0_14] : memref<1x96xf32, #tpu.memory_space<vmem>>, vector<1x96xf32>
    %28 = vector.broadcast %27 : vector<1x96xf32> to vector<8x96xf32>
    %29 = arith.addf %26, %28 : vector<8x96xf32>
    %30 = vector.extract_strided_slice %29 {offsets = [0, 32], sizes = [8, 32], strides = [1, 1]} : vector<8x96xf32> to vector<8x32xf32>
    %31 = tpu.transpose %30, [1, 0] : vector<8x32xf32> -> vector<32x8xf32>
    %32 = vector.extract_strided_slice %29 {offsets = [0, 0], sizes = [8, 8], strides = [1, 1]} : vector<8x96xf32> to vector<8x8xf32>
    %33 = arith.truncf %32 : vector<8x8xf32> to vector<8x8xbf16>
    %c0_15 = arith.constant 0 : index
    %c0_16 = arith.constant 0 : index
    %c0_17 = arith.constant 0 : index
    %c0_18 = arith.constant 0 : index
    %34 = vector.load %arg7[%c0_15, %c0_16, %c0_17, %c0_18] : memref<1x4x8x8xbf16, #tpu.memory_space<vmem>>, vector<1x1x8x8xbf16>
    %35 = vector.shape_cast %34 : vector<1x1x8x8xbf16> to vector<8x8xbf16>
    %36 = vector.shape_cast %33 : vector<8x8xbf16> to vector<1x1x8x8xbf16>
    tpu.vector_store %arg7[%c0_15, %c0_16, %c0_17, %c0_18], %36 {strides = array<i32>} : memref<1x4x8x8xbf16, #tpu.memory_space<vmem>>, vector<1x1x8x8xbf16>,
    %37 = vector.extract_strided_slice %29 {offsets = [0, 64], sizes = [8, 8], strides = [1, 1]} : vector<8x96xf32> to vector<8x8xf32>
    %38 = arith.truncf %37 : vector<8x8xf32> to vector<8x8xbf16>
    %c0_19 = arith.constant 0 : index
    %c0_20 = arith.constant 0 : index
    %c0_21 = arith.constant 0 : index
    %c0_22 = arith.constant 0 : index
    %39 = vector.load %arg9[%c0_19, %c0_20, %c0_21, %c0_22] : memref<1x4x8x8xbf16, #tpu.memory_space<vmem>>, vector<1x1x8x8xbf16>
    %40 = vector.shape_cast %39 : vector<1x1x8x8xbf16> to vector<8x8xbf16>
    %41 = vector.shape_cast %38 : vector<8x8xbf16> to vector<1x1x8x8xbf16>
    tpu.vector_store %arg9[%c0_19, %c0_20, %c0_21, %c0_22], %41 {strides = array<i32>} : memref<1x4x8x8xbf16, #tpu.memory_space<vmem>>, vector<1x1x8x8xbf16>,
    %42 = vector.extract_strided_slice %31 {offsets = [0, 0], sizes = [8, 8], strides = [1, 1]} : vector<32x8xf32> to vector<8x8xf32>
    %43 = arith.truncf %42 : vector<8x8xf32> to vector<8x8xbf16>
    %c0_23 = arith.constant 0 : index
    %c0_24 = arith.constant 0 : index
    %c0_25 = arith.constant 0 : index
    %c0_26 = arith.constant 0 : index
    %44 = vector.load %arg8[%c0_23, %c0_24, %c0_25, %c0_26] : memref<1x4x8x8xbf16, #tpu.memory_space<vmem>>, vector<1x1x8x8xbf16>
    %45 = vector.shape_cast %44 : vector<1x1x8x8xbf16> to vector<8x8xbf16>
    %46 = vector.shape_cast %43 : vector<8x8xbf16> to vector<1x1x8x8xbf16>
    tpu.vector_store %arg8[%c0_23, %c0_24, %c0_25, %c0_26], %46 {strides = array<i32>} : memref<1x4x8x8xbf16, #tpu.memory_space<vmem>>, vector<1x1x8x8xbf16>,
    %47 = vector.extract_strided_slice %29 {offsets = [0, 8], sizes = [8, 8], strides = [1, 1]} : vector<8x96xf32> to vector<8x8xf32>
    %48 = arith.truncf %47 : vector<8x8xf32> to vector<8x8xbf16>
    %c0_27 = arith.constant 0 : index
    %c1 = arith.constant 1 : index
    %c0_28 = arith.constant 0 : index
    %c0_29 = arith.constant 0 : index
    %49 = vector.load %arg7[%c0_27, %c1, %c0_28, %c0_29] : memref<1x4x8x8xbf16, #tpu.memory_space<vmem>>, vector<1x1x8x8xbf16>
    %50 = vector.shape_cast %49 : vector<1x1x8x8xbf16> to vector<8x8xbf16>
    %51 = vector.shape_cast %48 : vector<8x8xbf16> to vector<1x1x8x8xbf16>
    tpu.vector_store %arg7[%c0_27, %c1, %c0_28, %c0_29], %51 {strides = array<i32>} : memref<1x4x8x8xbf16, #tpu.memory_space<vmem>>, vector<1x1x8x8xbf16>,
    %52 = vector.extract_strided_slice %29 {offsets = [0, 72], sizes = [8, 8], strides = [1, 1]} : vector<8x96xf32> to vector<8x8xf32>
    %53 = arith.truncf %52 : vector<8x8xf32> to vector<8x8xbf16>
    %c0_30 = arith.constant 0 : index
    %c1_31 = arith.constant 1 : index
    %c0_32 = arith.constant 0 : index
    %c0_33 = arith.constant 0 : index
    %54 = vector.load %arg9[%c0_30, %c1_31, %c0_32, %c0_33] : memref<1x4x8x8xbf16, #tpu.memory_space<vmem>>, vector<1x1x8x8xbf16>
    %55 = vector.shape_cast %54 : vector<1x1x8x8xbf16> to vector<8x8xbf16>
    %56 = vector.shape_cast %53 : vector<8x8xbf16> to vector<1x1x8x8xbf16>
    tpu.vector_store %arg9[%c0_30, %c1_31, %c0_32, %c0_33], %56 {strides = array<i32>} : memref<1x4x8x8xbf16, #tpu.memory_space<vmem>>, vector<1x1x8x8xbf16>,
    %57 = vector.extract_strided_slice %31 {offsets = [8, 0], sizes = [8, 8], strides = [1, 1]} : vector<32x8xf32> to vector<8x8xf32>
    %58 = arith.truncf %57 : vector<8x8xf32> to vector<8x8xbf16>
    %c0_34 = arith.constant 0 : index
    %c1_35 = arith.constant 1 : index
    %c0_36 = arith.constant 0 : index
    %c0_37 = arith.constant 0 : index
    %59 = vector.load %arg8[%c0_34, %c1_35, %c0_36, %c0_37] : memref<1x4x8x8xbf16, #tpu.memory_space<vmem>>, vector<1x1x8x8xbf16>
    %60 = vector.shape_cast %59 : vector<1x1x8x8xbf16> to vector<8x8xbf16>
    %61 = vector.shape_cast %58 : vector<8x8xbf16> to vector<1x1x8x8xbf16>
    tpu.vector_store %arg8[%c0_34, %c1_35, %c0_36, %c0_37], %61 {strides = array<i32>} : memref<1x4x8x8xbf16, #tpu.memory_space<vmem>>, vector<1x1x8x8xbf16>,
    %62 = vector.extract_strided_slice %29 {offsets = [0, 16], sizes = [8, 8], strides = [1, 1]} : vector<8x96xf32> to vector<8x8xf32>
    %63 = arith.truncf %62 : vector<8x8xf32> to vector<8x8xbf16>
    %c0_38 = arith.constant 0 : index
    %c2 = arith.constant 2 : index
    %c0_39 = arith.constant 0 : index
    %c0_40 = arith.constant 0 : index
    %64 = vector.load %arg7[%c0_38, %c2, %c0_39, %c0_40] : memref<1x4x8x8xbf16, #tpu.memory_space<vmem>>, vector<1x1x8x8xbf16>
    %65 = vector.shape_cast %64 : vector<1x1x8x8xbf16> to vector<8x8xbf16>
    %66 = vector.shape_cast %63 : vector<8x8xbf16> to vector<1x1x8x8xbf16>
    tpu.vector_store %arg7[%c0_38, %c2, %c0_39, %c0_40], %66 {strides = array<i32>} : memref<1x4x8x8xbf16, #tpu.memory_space<vmem>>, vector<1x1x8x8xbf16>,
    %67 = vector.extract_strided_slice %29 {offsets = [0, 80], sizes = [8, 8], strides = [1, 1]} : vector<8x96xf32> to vector<8x8xf32>
    %68 = arith.truncf %67 : vector<8x8xf32> to vector<8x8xbf16>
    %c0_41 = arith.constant 0 : index
    %c2_42 = arith.constant 2 : index
    %c0_43 = arith.constant 0 : index
    %c0_44 = arith.constant 0 : index
    %69 = vector.load %arg9[%c0_41, %c2_42, %c0_43, %c0_44] : memref<1x4x8x8xbf16, #tpu.memory_space<vmem>>, vector<1x1x8x8xbf16>
    %70 = vector.shape_cast %69 : vector<1x1x8x8xbf16> to vector<8x8xbf16>
    %71 = vector.shape_cast %68 : vector<8x8xbf16> to vector<1x1x8x8xbf16>
    tpu.vector_store %arg9[%c0_41, %c2_42, %c0_43, %c0_44], %71 {strides = array<i32>} : memref<1x4x8x8xbf16, #tpu.memory_space<vmem>>, vector<1x1x8x8xbf16>,
    %72 = vector.extract_strided_slice %31 {offsets = [16, 0], sizes = [8, 8], strides = [1, 1]} : vector<32x8xf32> to vector<8x8xf32>
    %73 = arith.truncf %72 : vector<8x8xf32> to vector<8x8xbf16>
    %c0_45 = arith.constant 0 : index
    %c2_46 = arith.constant 2 : index
    %c0_47 = arith.constant 0 : index
    %c0_48 = arith.constant 0 : index
    %74 = vector.load %arg8[%c0_45, %c2_46, %c0_47, %c0_48] : memref<1x4x8x8xbf16, #tpu.memory_space<vmem>>, vector<1x1x8x8xbf16>
    %75 = vector.shape_cast %74 : vector<1x1x8x8xbf16> to vector<8x8xbf16>
    %76 = vector.shape_cast %73 : vector<8x8xbf16> to vector<1x1x8x8xbf16>
    tpu.vector_store %arg8[%c0_45, %c2_46, %c0_47, %c0_48], %76 {strides = array<i32>} : memref<1x4x8x8xbf16, #tpu.memory_space<vmem>>, vector<1x1x8x8xbf16>,
    %77 = vector.extract_strided_slice %29 {offsets = [0, 24], sizes = [8, 8], strides = [1, 1]} : vector<8x96xf32> to vector<8x8xf32>
    %78 = arith.truncf %77 : vector<8x8xf32> to vector<8x8xbf16>
    %c0_49 = arith.constant 0 : index
    %c3 = arith.constant 3 : index
    %c0_50 = arith.constant 0 : index
    %c0_51 = arith.constant 0 : index
    %79 = vector.load %arg7[%c0_49, %c3, %c0_50, %c0_51] : memref<1x4x8x8xbf16, #tpu.memory_space<vmem>>, vector<1x1x8x8xbf16>
    %80 = vector.shape_cast %79 : vector<1x1x8x8xbf16> to vector<8x8xbf16>
    %81 = vector.shape_cast %78 : vector<8x8xbf16> to vector<1x1x8x8xbf16>
    tpu.vector_store %arg7[%c0_49, %c3, %c0_50, %c0_51], %81 {strides = array<i32>} : memref<1x4x8x8xbf16, #tpu.memory_space<vmem>>, vector<1x1x8x8xbf16>,
    %82 = vector.extract_strided_slice %29 {offsets = [0, 88], sizes = [8, 8], strides = [1, 1]} : vector<8x96xf32> to vector<8x8xf32>
    %83 = arith.truncf %82 : vector<8x8xf32> to vector<8x8xbf16>
    %c0_52 = arith.constant 0 : index
    %c3_53 = arith.constant 3 : index
    %c0_54 = arith.constant 0 : index
    %c0_55 = arith.constant 0 : index
    %84 = vector.load %arg9[%c0_52, %c3_53, %c0_54, %c0_55] : memref<1x4x8x8xbf16, #tpu.memory_space<vmem>>, vector<1x1x8x8xbf16>
    %85 = vector.shape_cast %84 : vector<1x1x8x8xbf16> to vector<8x8xbf16>
    %86 = vector.shape_cast %83 : vector<8x8xbf16> to vector<1x1x8x8xbf16>
    tpu.vector_store %arg9[%c0_52, %c3_53, %c0_54, %c0_55], %86 {strides = array<i32>} : memref<1x4x8x8xbf16, #tpu.memory_space<vmem>>, vector<1x1x8x8xbf16>,
    %87 = vector.extract_strided_slice %31 {offsets = [24, 0], sizes = [8, 8], strides = [1, 1]} : vector<32x8xf32> to vector<8x8xf32>
    %88 = arith.truncf %87 : vector<8x8xf32> to vector<8x8xbf16>
    %c0_56 = arith.constant 0 : index
    %c3_57 = arith.constant 3 : index
    %c0_58 = arith.constant 0 : index
    %c0_59 = arith.constant 0 : index
    %89 = vector.load %arg8[%c0_56, %c3_57, %c0_58, %c0_59] : memref<1x4x8x8xbf16, #tpu.memory_space<vmem>>, vector<1x1x8x8xbf16>
    %90 = vector.shape_cast %89 : vector<1x1x8x8xbf16> to vector<8x8xbf16>
    %91 = vector.shape_cast %88 : vector<8x8xbf16> to vector<1x1x8x8xbf16>
    tpu.vector_store %arg8[%c0_56, %c3_57, %c0_58, %c0_59], %91 {strides = array<i32>} : memref<1x4x8x8xbf16, #tpu.memory_space<vmem>>, vector<1x1x8x8xbf16>,
    return
  }
  func.func @transform_0(%arg0: i32, %arg1: i32) -> (i32, i32, i32) {
    %c0_i32 = arith.constant 0 : i32
    %c0_i32_0 = arith.constant 0 : i32
    return %arg0, %arg1, %c0_i32 : i32, i32, i32
  }
  func.func @transform_1(%arg0: i32, %arg1: i32) -> (i32, i32) {
    %c0_i32 = arith.constant 0 : i32
    %c0_i32_0 = arith.constant 0 : i32
    %c0_i32_1 = arith.constant 0 : i32
    return %c0_i32, %c0_i32_0 : i32, i32
  }
  func.func @transform_2(%arg0: i32, %arg1: i32) -> (i32, i32) {
    %c0_i32 = arith.constant 0 : i32
    %c0_i32_0 = arith.constant 0 : i32
    %c0_i32_1 = arith.constant 0 : i32
    return %c0_i32, %c0_i32_0 : i32, i32
  }
  func.func @transform_3(%arg0: i32, %arg1: i32) -> (i32, i32) {
    %c0_i32 = arith.constant 0 : i32
    %c0_i32_0 = arith.constant 0 : i32
    %c0_i32_1 = arith.constant 0 : i32
    return %c0_i32, %c0_i32_0 : i32, i32
  }
  func.func @transform_4(%arg0: i32, %arg1: i32) -> (i32, i32) {
    %c0_i32 = arith.constant 0 : i32
    %c0_i32_0 = arith.constant 0 : i32
    %c0_i32_1 = arith.constant 0 : i32
    return %c0_i32, %c0_i32_0 : i32, i32
  }
  func.func @transform_5(%arg0: i32, %arg1: i32) -> (i32, i32, i32, i32) {
    %c0_i32 = arith.constant 0 : i32
    %c0_i32_0 = arith.constant 0 : i32
    %c0_i32_1 = arith.constant 0 : i32
    return %arg0, %c0_i32, %arg1, %c0_i32_0 : i32, i32, i32, i32
  }
  func.func @transform_6(%arg0: i32, %arg1: i32) -> (i32, i32, i32, i32) {
    %c0_i32 = arith.constant 0 : i32
    %c0_i32_0 = arith.constant 0 : i32
    %c0_i32_1 = arith.constant 0 : i32
    return %arg0, %c0_i32, %c0_i32_0, %arg1 : i32, i32, i32, i32
  }
  func.func @transform_7(%arg0: i32, %arg1: i32) -> (i32, i32, i32, i32) {
    %c0_i32 = arith.constant 0 : i32
    %c0_i32_0 = arith.constant 0 : i32
    %c0_i32_1 = arith.constant 0 : i32
    return %arg0, %c0_i32, %arg1, %c0_i32_0 : i32, i32, i32, i32
  }
}

</mosaic_0001>

<bundles_post_ra>
// kernel: tpu_custom_call.1
= control target key start
LH: loop header
LB: loop body
LE: loop exit
PB: predicated region body
PF: predicated region fallthrough
CT: control target
= control target key end

     0   :  { %s1460_s0 = inlined_call_operand.hbm [shape: f32[2,8,32], index: 0, kind: input, shape index: {}]   ;;  %s1461_s1 = inlined_call_operand.hbm [shape: f32[1,32], index: 1, kind: input, shape index: {}]   ;;  %s1462_s2 = inlined_call_operand.vmem [shape: f32[1,32], index: 2, kind: input, shape index: {}]   ;;  %s1463_s3 = inlined_call_operand.hbm [shape: bf16[32,96], index: 3, kind: input, shape index: {}]   ;;  %s1464_s4 = inlined_call_operand.vmem [shape: f32[1,96], index: 4, kind: input, shape index: {}]   ;;  %s1465_s5 = inlined_call_operand.hbm [shape: bf16[2,4,8,8], index: 5, kind: output, shape index: {0}]   ;;  %s1466_s6 = inlined_call_operand.hbm [shape: bf16[2,4,8,8], index: 6, kind: output, shape index: {1}]   ;;  %s1467_s7 = inlined_call_operand.hbm [shape: bf16[2,4,8,8], index: 7, kind: output, shape index: {2}]  }
   0x1   :  { %1471 = sst [smem:[#allocation16_spill]] %s1460_s0 }
   0x2   :  { %1472 = sst [smem:[#allocation17_spill]] %s1461_s1 }
   0x3   :  { %1473 = sst [smem:[#allocation18_spill]] %s1462_s2 }
   0x4   :  { %1474 = sst [smem:[#allocation19_spill]] %s1463_s3 }
   0x5   :  { %13 = vsyncpa [#allocation3], 0 }
   0x6   :  { %15 = vsyncpa [#allocation3 + $0x1], 0 }
   0x7   :  { %16 = vsyncpa [#allocation6], 0 }
   0x8   :  { %17 = vsyncpa [#allocation4], 0 }
   0x9   :  { %19 = vsyncpa [#allocation4 + $0x1], 0 }
   0xa   :  { %20 = vsyncpa [#allocation10], 0 }
   0xb   :  { %22 = vsyncpa [#allocation10 + $0x1], 0  ;;  %s1217_s24 = smov 0   ;;  %s1219_s25 = smov 0  }
   0xc   :  { %s1221_s26 = smov 0   ;;  %s1223_s27 = smov 0  }
   0xd   :  { %s1225_s28 = smov 0   ;;  %s1227_s29 = smov 0  }
   0xe LB: > { %s1248_s30 = sadd.s32 4294967295, %s1161_s29   ;;  %s1468_s8 = sadd.s32 4294967294, %s1161_s29   ;;  %s1161_s29 = sphi %s1227_s29, %s28_s29   ;;  %s1157_s28 = sphi %s1225_s28, %s1489_s28   ;;  %s1153_s27 = sphi %s1223_s27, %s1488_s27   ;;  %s1149_s26 = sphi %s1221_s26, %s1487_s26   ;;  %s1145_s25 = sphi %s1219_s25, %s1486_s25   ;;  %s1141_s24 = sphi %s1217_s24, %s1485_s24  }
   0xf   : > { %p62_p0 = scmp.ne.s32.totalorder %s1145_s25, %s1141_s24  ;;  %p63_p1 = scmp.eq.s32.totalorder %s1248_s30, 0 }
  0x10   : > { %p178_p2 = scmp.eq.s32.totalorder %s1468_s8, 1  ;;  %p765_p4 = scmp.ge.s32.totalorder %s1161_s29, 1 }
  0x11   : > { %p1258_p3 = por %p63_p1, %p62_p0  ;;  %p241_p6 = scmp.lt.s32.totalorder %s1161_s29, 3 }
  0x12   : > { %p1263_p5 = por %p178_p2, %p62_p0  ;;  %s1477_s1 = sld [smem:[#allocation17_spill]] }
  0x13   : > { %p1271_p7 = pnand %p765_p4, %p241_p6  ;;  %p768_p8 = scmp.ge.s32.totalorder %s1161_s29, 2 }
  0x14   : > { %s1163_s15 = smov [#allocation5]   ;;  %s1479_s3 = sld [smem:[#allocation19_spill]] }
  0x15   : > { %p828_p9 = pneg %p1271_p7  ;;  %s255_s16 = sshll.u32 %s1163_s15, 4  ;;  %s256_s16 = int_to_ptr.vmem [resolvable:$true] %s255_s16 }
  0x16   : > { %s1164_s20 = smov [#allocation7]   ;;  %s1165_s22 = smov 64  }
  0x17   : > { %p829_p10 = pnand %p828_p9, %p63_p1  ;;  %s269_s21 = sshll.u32 %s1164_s20, 4  ;;  %s270_s21 = int_to_ptr.vmem [resolvable:$true] %s269_s21 }
  0x18   : > { %s253_s13 = sshll.u32 %s1477_s1, 4  ;;  %s1166_s23 = smov 4   ;;  %s254_s13 = int_to_ptr.hbm [resolvable:$true] %s253_s13 }
  0x19   : > { %831 = dma.hbm_to_vmem [thread:$0]  (!%p829_p10), %s254_s13, 16, %s256_s16, [#allocation6]  }
  0x1a   : > { %s267_s19 = sshll.u32 %s1479_s3, 4  ;;  %p172_p11 = scmp.eq.s32.totalorder %s1248_s30, 1  ;;  %s268_s19 = int_to_ptr.hbm [resolvable:$true] %s267_s19 }
  0x1b   : > { %834 = dma.hbm_to_vmem [thread:$0]  (!%p829_p10), %s268_s19, 256, %s270_s21, [#allocation6], %s1165_s22, %s1165_s22, %s1166_s23  }
  0x1c   : > { %s40_s11 = sadd.s32 1, %s1157_s28  ;;  %s49_s12 = sadd.s32 1, %s1149_s26 }
  0x1d   : > { %p42_p12 = scmp.ge.s32.totalorder %s40_s11, 2  ;;  %p56_p13 = scmp.ne.s32.totalorder %s1149_s26, %s1145_s25 }
  0x1e   : > { %p57_p0 = scmp.eq.s32.totalorder %s1161_s29, 0  ;;  %p851_p4 = scmp.lt.s32.totalorder %s1161_s29, 2 }
  0x1f   : > { %s1491_s11 = smov (%p42_p12, %s40_s11), 0  ;;  %p1291_p2 = por %p172_p11, %p56_p13 }
  0x20   : > { %s44_s13 = ssub.s32 %s1157_s28, %s1491_s11  ;;  %s286_s16 = sand.u32 1, %s1149_s26  }
  0x21   : > { %p47_p6 = scmp.eq.s32.totalorder %s44_s13, 0  ;;  %p58_p9 = por %p57_p0, %p56_p13 }
  0x22   : > { %s769_s17 = sshll.u32 %s286_s16, 3  ;;  %s770_s18 = sshll.u32 %s1157_s28, 3 }
  0x23   : > { %s1301_s19 = scalar_select %p47_p6, %s1149_s26, %s49_s12  }
  0x24   : > { %s1481_s0 = sld [smem:[#allocation16_spill]]  ;;  %s290_s8 = scalar_lea.vmem [#allocation2], %s769_s17 }
  0x25   : > { %s299_s1 = sshll.u32 %s290_s8, 4  ;;  %p836_p10 = pnand %p851_p4, %p58_p9  ;;  %s300_s1 = int_to_ptr.vmem [resolvable:$true] %s299_s1 }
  0x26   : > { %s287_s3 = scalar_lea.sflag [#allocation3], %s286_s16  ;;  %s1311_s12 = sand.u32 (!%p1271_p7), 1, %s1145_s25  }
  0x27   : > { %s772_s13 = sshll.u32 (!%p1271_p7), %s1311_s12, 3 }
  0x28   : > { %308 = sbr.rel (%p1271_p7) target bundleno = 768 (0x300), region = 40  ;;  %s314_s20 = scalar_lea.vmem (!%p1271_p7), [#allocation2], %s772_s13 }
  0x2a   : > { %s295_s22 = scalar_lea.hbm %s1481_s0, %s770_s18  ;;  %s311_s18 = scalar_lea.sflag (!%p1271_p7), [#allocation3], %s1311_s12 }
  0x2b   : > { %s297_s23 = sshll.u32 %s295_s22, 4  ;;  %s298_s23 = int_to_ptr.hbm [resolvable:$true] %s297_s23 }
  0x2c   : > { %838 = dma.hbm_to_vmem [thread:$0]  (!%p836_p10), %s298_s23, 128, %s300_s1, %s287_s3  }
  0x2d   : > { %1124 = dma.done.wait (%p1258_p3), %s311_s18, 128  }
  0x2e   : > { %1126 = vsyncadd (%p1258_p3), %s311_s18, 4294967168 }
  0x2f   : > { %1128 = dma.done.wait (%p63_p1), [#allocation6], 272  }
  0x30   : > { %1130 = vsyncadd (%p63_p1), [#allocation6], 4294967024  ;;  %vm370_vm0 = vcmask 261120   ;;  %v367_v0 = vld [vmem:[%s314_s20] sm:$0xff]  ;;  %v1167_v2 = vmov 32.0   ;;  %v807_v15 = vld [vmem:[#allocation7] sm:$0xff] }
  0x31   : > { %v371_v1 = vsel %vm370_vm0, %v367_v0, 0.0  ;;  %921 = vrcp.f32 %v1167_v2  ;;  %v808_v14 = vld [vmem:[#allocation7 + $0x8] sm:$0xff]  ;;  %v918_v25 = vld [vmem:[#allocation5] ss:$0 sm:$0xff]  ;;  %s1482_s2 = sld [smem:[#allocation18_spill]]  ;;  %s1333_s14 = sshll.u32 %s1311_s12, 4 }
  0x32   : > { %372 = vadd.xlane.f32.xlu0 %v371_v1  ;;  %438 = vmatpush.bf16.msra.mxu0 %v808_v14  ;;  %v920_v32 = vld [vmem:[%s1464_s4] ss:$0 sm:$0xff]  ;;  %vm482_vm5 = vcmask 60416   ;;  %s1168_s16 = smov 96   ;;  %s1169_s17 = smov 56  }
  0x33   : > { %s1469_s21 = smov 64   ;;  %s1337_s22 = scalar_lea.vmem [#allocation8], %s1333_s14 }
  0x34   : > { %s1171_s23 = smov 40   ;;  %s1172_s13 = smov 120  }
  0x35   : > { %s1173_s18 = smov 112   ;;  %s1174_s20 = smov 48  }
  0x36   : > { %439 = vmatpush.bf16.msra.mxu0 %v807_v15  ;;  %s1175_s1 = smov 104   ;;  %s1342_s3 = scalar_lea.vmem [#allocation11], %s1333_s14 }
  0x37   : > { %v922_v3 = vpop.eup %921  ;;  %v919_v28 = vld [vmem:[%s1482_s2] ss:$0 sm:$0xff]  ;;  %s554_s8 = sshll.u32 %s1337_s22, 4  ;;  %s1360_s9 = sshll.u32 %s1153_s27, 4  ;;  %s555_s8 = int_to_ptr.vmem [resolvable:$true] %s554_s8 }
  0x38   : > { %v375_v4 = vmul.f32 32.0, %v922_v3  ;;  %vm379_vm1 = vweird.f32 %v922_v3  ;;  %s1035_s27 = scalar_lea.hbm %s1465_s5, 32 }
  0x3a   : > { %v376_v5 = vsub.f32 1.0, %v375_v4 }
  0x3c   : > { %v377_v6 = vmul.f32 %v922_v3, %v376_v5 }
  0x3e   : > { %v378_v7 = vadd.f32 %v922_v3, %v377_v6 }
  0x40   : > { %v380_v8 = vsel %vm379_vm1, %v922_v3, %v378_v7 }
  0xa5   : > { %v373_v9 = vpop.xlane.xlu0 %372 }
  0xa6   : > { %v381_v10 = vmul.f32 %v380_v8, %v373_v9 }
  0xa8   : > { %v382_v11 = vsub.f32 %v367_v0, %v381_v10 }
  0xaa   : > { %v383_v12 = vmul.f32 %v382_v11, %v382_v11 }
  0xac   : > { %v384_v13 = vsel %vm370_vm0, %v383_v12, 0.0 }
  0xad   : > { %385 = vadd.xlane.f32.xlu0 %v384_v13 }
 0x120   : > { %v386_v16 = vpop.xlane.xlu0 %385 }
 0x121   : > { %v387_v17 = vmul.f32 %v386_v16, %v380_v8 }
 0x123   : > { %v388_v18 = vadd.f32 1e-05, %v387_v17 }
 0x125   : > { %923 = vrsqrt.f32 %v388_v18  ;;  %vm395_vm3 = vweird.f32 %v388_v18 }
 0x12b   : > { %v924_v19 = vpop.eup %923 }
 0x12c   : > { %v390_v20 = vmul.f32 %v924_v19, %v388_v18  ;;  %vm396_vm2 = vweird.f32 %v924_v19 }
 0x12d   : > { %vm397_vm4 = vmor %vm395_vm3, %vm396_vm2 }
 0x12e   : > { %v391_v21 = vmul.f32 %v924_v19, %v390_v20 }
 0x130   : > { %v392_v22 = vmul.f32 0.5, %v391_v21 }
 0x132   : > { %v393_v23 = vsub.f32 1.5, %v392_v22 }
 0x134   : > { %v394_v24 = vmul.f32 %v924_v19, %v393_v23 }
 0x136   : > { %v398_v26 = vsel %vm397_vm4, %v924_v19, %v394_v24 }
 0x137   : > { %v399_v27 = vmul.f32 %v398_v26, %v382_v11 }
 0x139   : > { %v403_v29 = vmul.f32 %v918_v25, %v399_v27 }
 0x13b   : > { %v407_v30 = vadd.f32 %v919_v28, %v403_v29 }
 0x13d   : > { %v408_v31 = vpack.c.bf16 %v407_v30, %v407_v30 }
 0x13f   : > { %786 = vmatmul.msk.bf16.vlgmr.msra.gmra.mxu0 %vm370_vm0, %v408_v31 }
 0x1bc   : > { %v441_v33 = vpop.f32.mrf.mxu0 }
 0x1bd   : > { %v442_v34 = vadd.f32 %v920_v32, %v441_v33 }
 0x1bf   : > { %v481_v35 = vpack.c.bf16 %v442_v34, %v442_v34  ;;  %446 = vrot.lane.b32.xlu1 %v442_v34, %s1168_s16 }
 0x1c1   : > { %496 = vrot.lane.b32.xlu0 %v481_v35, %s1169_s17  ;;  %485 = vrot.lane.b32.xlu2 %v481_v35, %s1469_s21  ;;  %483 = vst.msk [vmem:[%s1337_s22] sm:$0xf] %vm482_vm5, %v481_v35 }
 0x1c4   : > { %v443_v36 = vpop.f32.mrf.mxu0 }
 0x1c9   : > { %522 = vrot.lane.b32.xlu0 %v481_v35, %s1171_s23  ;;  %491 = vrot.lane.b32.xlu2 %v481_v35, %s1172_s13  ;;  %s553_s23 = scalar_lea.hbm %s1465_s5, %s1360_s9 }
 0x1ca   : > { %s556_s13 = sshll.u32 %s553_s23, 4  ;;  %s557_s13 = int_to_ptr.hbm [resolvable:$true] %s556_s13 }
 0x1d1   : > { %504 = vrot.lane.b32.xlu2 %v481_v35, %s1173_s18  ;;  %s531_s18 = scalar_lea.sflag [#allocation4], %s1311_s12 }
 0x1d9   : > { %509 = vrot.lane.b32.xlu2 %v481_v35, %s1174_s20  ;;  %s1029_s20 = sshra.s32 %s557_s13, 4  ;;  %s1030_s20 = int_to_ptr.hbm [resolvable:$true] %s1029_s20 }
 0x1da   : > { %p1036_p11 = scmp.lt.s32.totalorder %s1030_s20, %s1465_s5 }
 0x1e1   : > { %517 = vrot.lane.b32.xlu2 %v481_v35, %s1175_s1  ;;  %s1031_s1 = scalar_lea.hbm %s1030_s20, 16 }
 0x1e2   : > { %p1032_p1 = scmp.ne.s32.totalorder %s1030_s20, %s1031_s1  ;;  %p1037_p12 = scmp.lt.s32.totalorder %s1035_s27, %s1031_s1 }
 0x1e4   : > { %p1033_p3 = pnand %p1032_p1, %p1291_p2  ;;  %p1038_p13 = por %p1037_p12, %p1036_p11 }
 0x1e6   : > { %p1034_p7 = pneg %p1033_p3 }
 0x1e8   : > { %p1039_p0 = pnand %p1038_p13, %p1034_p7 }
 0x21b   : > { %v486_v37 = vpop.permute.xlu2 %485 }
 0x21c   : > { %488 = vst.msk [vmem:[%s1342_s3] sm:$0xf] %vm482_vm5, %v486_v37 }
 0x223   : > { %v492_v38 = vpop.permute.xlu2 %491 }
 0x224   : > { %787 = vst.msk [vmem:[%s1337_s22 + $0x4] sm:$0xf] %vm482_vm5, %v492_v38 }
 0x22b   : > { %v505_v39 = vpop.permute.xlu2 %504 }
 0x22c   : > { %790 = vst.msk [vmem:[%s1337_s22 + $0x8] sm:$0xf] %vm482_vm5, %v505_v39 }
 0x231   : > { %v447_v40 = vpop.permute.xlu1 %446 }
 0x232   : > { %449 = vxpose.xlu1.b32.start.end [1/1] (short) (narrow) %v447_v40, 32 }
 0x233   : > { %v497_v41 = vpop.permute.xlu0 %496  ;;  %v510_v42 = vpop.permute.xlu2 %509 }
 0x234   : > { %788 = vst.msk [vmem:[%s1342_s3 + $0x4] sm:$0xf] %vm482_vm5, %v497_v41 }
 0x235   : > { %791 = vst.msk [vmem:[%s1342_s3 + $0x8] sm:$0xf] %vm482_vm5, %v510_v42 }
 0x23b   : > { %v523_v43 = vpop.permute.xlu0 %522  ;;  %v518_v44 = vpop.permute.xlu2 %517 }
 0x23c   : > { %794 = vst.msk [vmem:[%s1342_s3 + $0xc] sm:$0xf] %vm482_vm5, %v523_v43 }
 0x23d   : > { %793 = vst.msk [vmem:[%s1337_s22 + $0xc] sm:$0xf] %vm482_vm5, %v518_v44 }
 0x23e   : > { %1042 = shalt.err (!%p1039_p0)
}
 0x23f   : > { %s1176_s12 = smov 4   ;;  %s1483_s16 = smov 64  }
 0x240   : > { %822 = dma.vmem_to_hbm [thread:$0]  (%p1291_p2), %s555_s8, 256, %s557_s13, %s531_s18, %s1483_s16, %s1483_s16, %s1176_s12  }
 0x241   : > { %s358_s0 = scalar_lea.vmem [#allocation9], %s1333_s14  ;;  %s571_s17 = scalar_lea.hbm %s1466_s6, %s1360_s9 }
 0x242   : > { %s589_s13 = scalar_lea.hbm %s1467_s7, %s1360_s9  ;;  %s572_s18 = sshll.u32 %s358_s0, 4  ;;  %s573_s18 = int_to_ptr.vmem [resolvable:$true] %s572_s18 }
 0x243   : > { %s535_s14 = sand.u32 1, %s1248_s30   ;;  %s574_s20 = sshll.u32 %s571_s17, 4  ;;  %s575_s20 = int_to_ptr.hbm [resolvable:$true] %s574_s20 }
 0x244   : > { %s590_s1 = sshll.u32 %s1342_s3, 4  ;;  %s1394_s22 = sshll.u32 %s589_s13, 4  ;;  %s1396_s1 = int_to_ptr.vmem [resolvable:$true] %s590_s1  ;;  %s593_s22 = int_to_ptr.hbm [resolvable:$true] %s1394_s22 }
 0x245   : > { %s1400_s27 = scalar_lea.sflag [#allocation10], %s535_s14  ;;  %s1057_s9 = sshra.s32 %s575_s20, 4  ;;  %s1058_s9 = int_to_ptr.hbm [resolvable:$true] %s1057_s9 }
 0x246   : > { %s1059_s30 = scalar_lea.hbm %s1058_s9, 16  ;;  %s1063_s21 = scalar_lea.hbm %s1466_s6, 32 }
 0x247   : > { %p1060_p4 = scmp.ne.s32.totalorder %s1058_s9, %s1059_s30  ;;  %p1064_p10 = scmp.lt.s32.totalorder %s1058_s9, %s1466_s6 }
 0x248   : > { %p1065_p1 = scmp.lt.s32.totalorder %s1063_s21, %s1059_s30 }
 0x249   : > { %p1061_p6 = pnand %p1060_p4, %p1291_p2 }
 0x24a   : > { %p1066_p3 = por %p1065_p1, %p1064_p10 }
 0x24b   : > { %p1062_p9 = pneg %p1061_p6 }
 0x24d   : > { %p1067_p7 = pnand %p1066_p3, %p1062_p9 }
 0x2d6   : > { %v465_v45 = vpop.trf.xlu1 }
 0x2d7   : > { %v489_v46 = vpack.c.bf16 %v465_v45, %v465_v45 }
 0x2d9   : > { %490 = vst.msk [vmem:[%s358_s0] sm:$0xf] %vm482_vm5, %v489_v46 }
 0x2de   : > { %v466_v47 = vpop.trf.xlu1 }
 0x2df   : > { %v501_v48 = vpack.c.bf16 %v466_v47, %v466_v47 }
 0x2e1   : > { %789 = vst.msk [vmem:[%s358_s0 + $0x4] sm:$0xf] %vm482_vm5, %v501_v48 }
 0x2e6   : > { %v467_v49 = vpop.trf.xlu1 }
 0x2e7   : > { %v514_v50 = vpack.c.bf16 %v467_v49, %v467_v49 }
 0x2e9   : > { %792 = vst.msk [vmem:[%s358_s0 + $0x8] sm:$0xf] %vm482_vm5, %v514_v50 }
 0x2ee   : > { %v468_v51 = vpop.trf.xlu1 }
 0x2ef   : > { %v527_v52 = vpack.c.bf16 %v468_v51, %v468_v51 }
 0x2f1   : > { %795 = vst.msk [vmem:[%s358_s0 + $0xc] sm:$0xf] %vm482_vm5, %v527_v52 }
 0x2f2   : > { %1070 = shalt.err (!%p1067_p7)
}
 0x2f3   : > { %823 = dma.vmem_to_hbm [thread:$0]  (%p1291_p2), %s573_s18, 256, %s575_s20, %s1400_s27, %s1483_s16, %s1483_s16, %s1176_s12  }
 0x2f4   : > { %s1085_s0 = sshra.s32 %s593_s22, 4  ;;  %s1091_s9 = scalar_lea.hbm %s1467_s7, 32  ;;  %s1086_s0 = int_to_ptr.hbm [resolvable:$true] %s1085_s0 }
 0x2f5   : > { %s1087_s8 = scalar_lea.hbm %s1086_s0, 16  ;;  %p1092_p0 = scmp.lt.s32.totalorder %s1086_s0, %s1467_s7 }
 0x2f6   : > { %p1088_p11 = scmp.ne.s32.totalorder %s1086_s0, %s1087_s8  ;;  %p1093_p4 = scmp.lt.s32.totalorder %s1091_s9, %s1087_s8 }
 0x2f8   : > { %p1089_p12 = pnand %p1088_p11, %p1291_p2  ;;  %p1094_p6 = por %p1093_p4, %p1092_p0 }
 0x2fa   : > { %p1090_p13 = pneg %p1089_p12 }
 0x2fc   : > { %p1095_p9 = pnand %p1094_p6, %p1090_p13 }
 0x2fe   : > { %1098 = shalt.err (!%p1095_p9)
}
 0x2ff   : > { %824 = dma.vmem_to_hbm [thread:$0]  (%p1291_p2), %s1396_s1, 256, %s593_s22, %s1400_s27, %s1483_s16, %s1483_s16, %s1176_s12  }
 0x300 PF: > { %s607_s18 = sand.u32 1, %s1141_s24   ;;  %p840_p10 = pnand %p768_p8, %p1263_p5 }
 0x301   : > { %s608_s20 = scalar_lea.sflag [#allocation4], %s607_s18 }
 0x302   : > { %p841_p1 = pneg %p840_p10 }
 0x304   : > { %1132 = dma.done.wait (%p841_p1), %s608_s20, 256  }
 0x305   : > { %1134 = vsyncadd (%p841_p1), %s608_s20, 4294967040  ;;  %s1484_s15 = sadd.s32 4294967294, %s1161_s29  }
 0x306   : > { %s617_s2 = sand.u32 1, %s1484_s15  }
 0x307   : > { %s618_s21 = scalar_lea.sflag [#allocation10], %s617_s2 }
 0x308   : > { %1136 = dma.done.wait (%p841_p1), %s618_s21, 512  }
 0x309   : > { %1138 = vsyncadd (%p841_p1), %s618_s21, 4294966784  ;;  %s28_s29 = sadd.s32 1, %s1161_s29   ;;  %s1485_s24 = smov %s1145_s25 }
 0x30a   : > { %p25_p2 = scmp.ge.s32.totalorder %s28_s29, 4   ;;  %s1486_s25 = smov %s1149_s26 }
 0x30b   : > { %s1487_s26 = smov %s1301_s19  ;;  %s1488_s27 = smov %s1157_s28 }
 0x30c   : > { %s1489_s28 = smov %s1491_s11  ;;  %27 = sbr.rel (!%p25_p2) target bundleno = 14 (0xe), region = 134 }
 0x311   :  { %634 = vsyncpa [#allocation3], 1 }
 0x312   :  { %636 = vsyncpa [#allocation3 + $0x1], 1 }
 0x313   :  { %637 = vsyncpa [#allocation6], 1 }
 0x314   :  { %638 = vsyncpa [#allocation4], 1 }
 0x315   :  { %640 = vsyncpa [#allocation4 + $0x1], 1 }
 0x316   :  { %641 = vsyncpa [#allocation10], 1 }
 0x317   :  { %643 = vsyncpa [#allocation10 + $0x1], 1 }

</bundles_post_ra>
